<compile_context>
chip_gen: v7x
topology: tpu7x:2x2x1
jax: 0.10.0
libtpu: 0.0.40
codegen_flags: <defaults>
</compile_context>

<pallas_src>
import functools

import jax
import jax.numpy as jnp
from jax.experimental import pallas as pl
from jax.experimental.pallas import tpu as pltpu

LANE = 128  # TPU lane width


def actor_mlp_kernel(x_ref,
                     w1_ref, b1_ref,
                     w2_ref, b2_ref,
                     w3_ref, b3_ref,
                     w4_ref, b4_ref,
                     w5_ref, b5_ref,
                     o_ref):
    """Fused MLP forward for one batch tile. All matmuls hit the MXU."""

    def dense(h, w_ref, b_ref):
        # Cast the LHS to the weight dtype so bf16 weights give a real bf16 MXU
        # pass; accumulate in f32. Bias add stays f32 (VPU-safe on v5e).
        return jnp.dot(h.astype(w_ref.dtype), w_ref[...],
                       preferred_element_type=jnp.float32) + b_ref[...]

    h = x_ref[...]
    h = jnp.maximum(dense(h, w1_ref, b1_ref), 0.0)
    h = jnp.maximum(dense(h, w2_ref, b2_ref), 0.0)
    h = jnp.maximum(dense(h, w3_ref, b3_ref), 0.0)
    h = jnp.maximum(dense(h, w4_ref, b4_ref), 0.0)
    o_ref[...] = jnp.tanh(dense(h, w5_ref, b5_ref)).astype(o_ref.dtype)


def _pad_axis(a, axis, multiple):
    """Zero-pad `axis` of `a` up to a multiple of `multiple`."""
    pad = (-a.shape[axis]) % multiple
    if pad == 0:
        return a
    widths = [(0, 0)] * a.ndim
    widths[axis] = (0, pad)
    return jnp.pad(a, widths)


@functools.partial(jax.jit, static_argnames=("batch_tile", "compute_dtype"))
def actor_forward(x, params, batch_tile=128, compute_dtype=jnp.float32):
    """x: (B, num_inputs) float32 -> (B, num_outputs) float32."""
    (w1, b1), (w2, b2), (w3, b3), (w4, b4), (w5, b5) = params
    B, num_inputs = x.shape
    num_outputs = w5.shape[1]

    # ---- Lane-dense layout plumbing (exactness preserved: pads are zeros) ----
    x_p = _pad_axis(x.astype(jnp.float32), 1, LANE)      # (B, Kp)
    w1_p = _pad_axis(w1, 0, LANE)                         # (Kp, 256)
    w5_p = _pad_axis(w5, 1, LANE)                         # (128, Np)
    b5_p = _pad_axis(b5, 1, LANE)                         # (1, Np)
    Kp = x_p.shape[1]
    Np = w5_p.shape[1]

    cdt = jnp.dtype(compute_dtype)
    w1_c = w1_p.astype(cdt)
    w2_c = w2.astype(cdt)
    w3_c = w3.astype(cdt)
    w4_c = w4.astype(cdt)
    w5_c = w5_p.astype(cdt)
    # Biases stay f32 (added to the f32 accumulator).
    b1_f, b2_f, b3_f, b4_f = (b.astype(jnp.float32) for b in (b1, b2, b3, b4))
    b5_f = b5_p.astype(jnp.float32)

    # ---- Batch tiling: pad batch to a multiple of the (large) batch tile ----
    B_pad = ((B + batch_tile - 1) // batch_tile) * batch_tile
    if B_pad != B:
        x_p = jnp.pad(x_p, ((0, B_pad - B), (0, 0)))
    grid = (B_pad // batch_tile,)

    def x_map(i):
        return (i, 0)

    # Tiny constant-index weights/biases: whole arrays resident in VMEM, no
    # per-step blocking and no redundant double-buffering.
    vmem_spec = pl.BlockSpec(memory_space=pltpu.MemorySpace.VMEM)
    weight_specs = [vmem_spec] * 10

    # Advisory cost estimate for the XLA scheduler.
    flops = 2 * B_pad * (Kp * 256 + 256 * 128 + 128 * 128 + 128 * 128 + 128 * Np)
    weight_bytes = (w1_c.size + w2_c.size + w3_c.size + w4_c.size + w5_c.size) * cdt.itemsize
    bias_bytes = (b1_f.size + b2_f.size + b3_f.size + b4_f.size + b5_f.size) * 4
    bytes_accessed = x_p.size * 4 + weight_bytes + bias_bytes + B_pad * Np * 4
    cost = pl.CostEstimate(flops=int(flops),
                           transcendentals=int(B_pad * Np),
                           bytes_accessed=int(bytes_accessed))

    out = pl.pallas_call(
        actor_mlp_kernel,
        out_shape=jax.ShapeDtypeStruct((B_pad, Np), jnp.float32),
        grid_spec=pltpu.PrefetchScalarGridSpec(
            num_scalar_prefetch=0,
            grid=grid,
            in_specs=[pl.BlockSpec((batch_tile, Kp), x_map)] + weight_specs,
            out_specs=pl.BlockSpec((batch_tile, Np), x_map),
        ),
        compiler_params=pltpu.CompilerParams(
            dimension_semantics=("parallel",)),
        cost_estimate=cost,
    )(x_p, w1_c, b1_f, w2_c, b2_f, w3_c, b3_f, w4_c, b4_f, w5_c, b5_f)

    # Slice away batch padding and the zero-padded output lanes (exact zeros).
    return out[:B, :num_outputs]


def init_actor_params(key, num_inputs, num_outputs):
    """Deterministic init mimicking nn.Linear default: U(-1/sqrt(fan_in), 1/sqrt(fan_in))."""
    dims = [num_inputs, 256, 128, 128, 128, num_outputs]
    params = []
    for i in range(5):
        fan_in, fan_out = dims[i], dims[i + 1]
        key, kw, kb = jax.random.split(key, 3)
        bound = 1.0 / jnp.sqrt(fan_in)
        # Stored as (in, out) = transpose of torch's (out, in) weight layout.
        w = jax.random.uniform(kw, (fan_in, fan_out), jnp.float32, -bound, bound)
        b = jax.random.uniform(kb, (1, fan_out), jnp.float32, -bound, bound)
        params.append((w, b))
    return params


def actor_forward_ref(x, params):
    """Pure-JAX reference for correctness checking."""
    h = x
    for i, (w, b) in enumerate(params):
        h = jnp.dot(h, w) + b
        h = jnp.tanh(h) if i == 4 else jnp.maximum(h, 0.0)
    return h


if __name__ == "__main__":
    key = jax.random.PRNGKey(0)
    num_inputs, num_outputs = 32, 8
    batch = 2

    kp, kx = jax.random.split(key)
    params = init_actor_params(kp, num_inputs, num_outputs)
    x = jax.random.normal(kx, (batch, num_inputs), jnp.float32)

    ref = actor_forward_ref(x, params)

    # f32 path (v5e-safe, exact vs reference up to matmul rounding).
    out = jax.block_until_ready(actor_forward(x, params))
    assert out.shape == (batch, num_outputs), out.shape
    assert jnp.allclose(out, ref, atol=1e-5, rtol=1e-5), (
        "f32 mismatch vs reference: max abs diff = "
        f"{float(jnp.max(jnp.abs(out - ref)))}")

    # bf16-weight fast path (v6e/v7x MXU-native); looser tolerance.
    out_bf16 = jax.block_until_ready(
        actor_forward(x, params, compute_dtype=jnp.bfloat16))
    assert out_bf16.shape == (batch, num_outputs), out_bf16.shape
    assert jnp.allclose(out_bf16, ref, atol=5e-2, rtol=5e-2), (
        "bf16 mismatch vs reference: max abs diff = "
        f"{float(jnp.max(jnp.abs(out_bf16 - ref)))}")

    print("KERNEL_OK")
</pallas_src>

<mosaic_0001>
module attributes {stable_mosaic.version = 11 : i64} {
  func.func @actor_mlp_kernel(%arg0: i32, %arg1: memref<128x128xf32, #tpu.memory_space<vmem>>, %arg2: memref<128x256xf32, #tpu.memory_space<vmem>>, %arg3: memref<1x256xf32, #tpu.memory_space<vmem>>, %arg4: memref<256x128xf32, #tpu.memory_space<vmem>>, %arg5: memref<1x128xf32, #tpu.memory_space<vmem>>, %arg6: memref<128x128xf32, #tpu.memory_space<vmem>>, %arg7: memref<1x128xf32, #tpu.memory_space<vmem>>, %arg8: memref<128x128xf32, #tpu.memory_space<vmem>>, %arg9: memref<1x128xf32, #tpu.memory_space<vmem>>, %arg10: memref<128x128xf32, #tpu.memory_space<vmem>>, %arg11: memref<1x128xf32, #tpu.memory_space<vmem>>, %arg12: memref<128x128xf32, #tpu.memory_space<vmem>>) attributes {dimension_semantics = [#tpu.dimension_semantics<parallel>], iteration_bounds = array<i64: 1>, scalar_prefetch = 0 : i64, scratch_operands = 0 : i64, tpu.core_type = #tpu.core_type<tc>, window_params = [{transform_indices = @transform_0, window_bounds = array<i64: 128, 128>}, {pipeline_mode = #tpu.pipeline_mode<synchronous>, transform_indices = @transform_1, window_bounds = array<i64: 128, 256>}, {pipeline_mode = #tpu.pipeline_mode<synchronous>, transform_indices = @transform_2, window_bounds = array<i64: 1, 256>}, {pipeline_mode = #tpu.pipeline_mode<synchronous>, transform_indices = @transform_3, window_bounds = array<i64: 256, 128>}, {pipeline_mode = #tpu.pipeline_mode<synchronous>, transform_indices = @transform_4, window_bounds = array<i64: 1, 128>}, {pipeline_mode = #tpu.pipeline_mode<synchronous>, transform_indices = @transform_5, window_bounds = array<i64: 128, 128>}, {pipeline_mode = #tpu.pipeline_mode<synchronous>, transform_indices = @transform_6, window_bounds = array<i64: 1, 128>}, {pipeline_mode = #tpu.pipeline_mode<synchronous>, transform_indices = @transform_7, window_bounds = array<i64: 128, 128>}, {pipeline_mode = #tpu.pipeline_mode<synchronous>, transform_indices = @transform_8, window_bounds = array<i64: 1, 128>}, {pipeline_mode = #tpu.pipeline_mode<synchronous>, transform_indices = @transform_9, window_bounds = array<i64: 128, 128>}, {pipeline_mode = #tpu.pipeline_mode<synchronous>, transform_indices = @transform_10, window_bounds = array<i64: 1, 128>}, {transform_indices = @transform_11, window_bounds = array<i64: 128, 128>}]} {
    %c0 = arith.constant 0 : index
    %c0_0 = arith.constant 0 : index
    %0 = vector.load %arg1[%c0, %c0_0] : memref<128x128xf32, #tpu.memory_space<vmem>>, vector<128x128xf32>
    %c0_1 = arith.constant 0 : index
    %c0_2 = arith.constant 0 : index
    %1 = vector.load %arg2[%c0_1, %c0_2] : memref<128x256xf32, #tpu.memory_space<vmem>>, vector<128x256xf32>
    %cst = arith.constant dense<0.000000e+00> : vector<128x256xf32>
    %2 = tpu.matmul %0, %1, %cst {dimension_numbers = #tpu.dot_dimension_numbers<[1], [0], [0], [1], [0, 0, 1, 1], [], []>} : vector<128x128xf32>, vector<128x256xf32>, vector<128x256xf32> -> vector<128x256xf32>
    %c0_3 = arith.constant 0 : index
    %c0_4 = arith.constant 0 : index
    %3 = vector.load %arg3[%c0_3, %c0_4] : memref<1x256xf32, #tpu.memory_space<vmem>>, vector<1x256xf32>
    %4 = vector.broadcast %3 : vector<1x256xf32> to vector<128x256xf32>
    %5 = arith.addf %2, %4 : vector<128x256xf32>
    %cst_5 = arith.constant 0.000000e+00 : f32
    %6 = vector.broadcast %cst_5 : f32 to vector<128x256xf32>
    %7 = arith.maximumf %5, %6 : vector<128x256xf32>
    %c0_6 = arith.constant 0 : index
    %c0_7 = arith.constant 0 : index
    %8 = vector.load %arg4[%c0_6, %c0_7] : memref<256x128xf32, #tpu.memory_space<vmem>>, vector<256x128xf32>
    %cst_8 = arith.constant dense<0.000000e+00> : vector<128x128xf32>
    %9 = tpu.matmul %7, %8, %cst_8 {dimension_numbers = #tpu.dot_dimension_numbers<[1], [0], [0], [1], [0, 0, 1, 1], [], []>} : vector<128x256xf32>, vector<256x128xf32>, vector<128x128xf32> -> vector<128x128xf32>
    %c0_9 = arith.constant 0 : index
    %c0_10 = arith.constant 0 : index
    %10 = vector.load %arg5[%c0_9, %c0_10] : memref<1x128xf32, #tpu.memory_space<vmem>>, vector<1x128xf32>
    %11 = vector.broadcast %10 : vector<1x128xf32> to vector<128x128xf32>
    %12 = arith.addf %9, %11 : vector<128x128xf32>
    %cst_11 = arith.constant 0.000000e+00 : f32
    %13 = vector.broadcast %cst_11 : f32 to vector<128x128xf32>
    %14 = arith.maximumf %12, %13 : vector<128x128xf32>
    %c0_12 = arith.constant 0 : index
    %c0_13 = arith.constant 0 : index
    %15 = vector.load %arg6[%c0_12, %c0_13] : memref<128x128xf32, #tpu.memory_space<vmem>>, vector<128x128xf32>
    %cst_14 = arith.constant dense<0.000000e+00> : vector<128x128xf32>
    %16 = tpu.matmul %14, %15, %cst_14 {dimension_numbers = #tpu.dot_dimension_numbers<[1], [0], [0], [1], [0, 0, 1, 1], [], []>} : vector<128x128xf32>, vector<128x128xf32>, vector<128x128xf32> -> vector<128x128xf32>
    %c0_15 = arith.constant 0 : index
    %c0_16 = arith.constant 0 : index
    %17 = vector.load %arg7[%c0_15, %c0_16] : memref<1x128xf32, #tpu.memory_space<vmem>>, vector<1x128xf32>
    %18 = vector.broadcast %17 : vector<1x128xf32> to vector<128x128xf32>
    %19 = arith.addf %16, %18 : vector<128x128xf32>
    %cst_17 = arith.constant 0.000000e+00 : f32
    %20 = vector.broadcast %cst_17 : f32 to vector<128x128xf32>
    %21 = arith.maximumf %19, %20 : vector<128x128xf32>
    %c0_18 = arith.constant 0 : index
    %c0_19 = arith.constant 0 : index
    %22 = vector.load %arg8[%c0_18, %c0_19] : memref<128x128xf32, #tpu.memory_space<vmem>>, vector<128x128xf32>
    %cst_20 = arith.constant dense<0.000000e+00> : vector<128x128xf32>
    %23 = tpu.matmul %21, %22, %cst_20 {dimension_numbers = #tpu.dot_dimension_numbers<[1], [0], [0], [1], [0, 0, 1, 1], [], []>} : vector<128x128xf32>, vector<128x128xf32>, vector<128x128xf32> -> vector<128x128xf32>
    %c0_21 = arith.constant 0 : index
    %c0_22 = arith.constant 0 : index
    %24 = vector.load %arg9[%c0_21, %c0_22] : memref<1x128xf32, #tpu.memory_space<vmem>>, vector<1x128xf32>
    %25 = vector.broadcast %24 : vector<1x128xf32> to vector<128x128xf32>
    %26 = arith.addf %23, %25 : vector<128x128xf32>
    %cst_23 = arith.constant 0.000000e+00 : f32
    %27 = vector.broadcast %cst_23 : f32 to vector<128x128xf32>
    %28 = arith.maximumf %26, %27 : vector<128x128xf32>
    %c0_24 = arith.constant 0 : index
    %c0_25 = arith.constant 0 : index
    %29 = vector.load %arg10[%c0_24, %c0_25] : memref<128x128xf32, #tpu.memory_space<vmem>>, vector<128x128xf32>
    %cst_26 = arith.constant dense<0.000000e+00> : vector<128x128xf32>
    %30 = tpu.matmul %28, %29, %cst_26 {dimension_numbers = #tpu.dot_dimension_numbers<[1], [0], [0], [1], [0, 0, 1, 1], [], []>} : vector<128x128xf32>, vector<128x128xf32>, vector<128x128xf32> -> vector<128x128xf32>
    %c0_27 = arith.constant 0 : index
    %c0_28 = arith.constant 0 : index
    %31 = vector.load %arg11[%c0_27, %c0_28] : memref<1x128xf32, #tpu.memory_space<vmem>>, vector<1x128xf32>
    %32 = vector.broadcast %31 : vector<1x128xf32> to vector<128x128xf32>
    %33 = arith.addf %30, %32 : vector<128x128xf32>
    %34 = math.tanh %33 : vector<128x128xf32>
    %c0_29 = arith.constant 0 : index
    %c0_30 = arith.constant 0 : index
    %35 = vector.load %arg12[%c0_29, %c0_30] : memref<128x128xf32, #tpu.memory_space<vmem>>, vector<128x128xf32>
    tpu.vector_store %arg12[%c0_29, %c0_30], %34 {strides = array<i32>} : memref<128x128xf32, #tpu.memory_space<vmem>>, vector<128x128xf32>,
    return
  }
  func.func @transform_0(%arg0: i32) -> (i32, i32) {
    %c0_i32 = arith.constant 0 : i32
    %c0_i32_0 = arith.constant 0 : i32
    return %arg0, %c0_i32 : i32, i32
  }
  func.func @transform_1(%arg0: i32) -> (i32, i32) {
    %c0_i32 = arith.constant 0 : i32
    %c0_i32_0 = arith.constant 0 : i32
    %c0_i32_1 = arith.constant 0 : i32
    return %c0_i32, %c0_i32_0 : i32, i32
  }
  func.func @transform_2(%arg0: i32) -> (i32, i32) {
    %c0_i32 = arith.constant 0 : i32
    %c0_i32_0 = arith.constant 0 : i32
    %c0_i32_1 = arith.constant 0 : i32
    return %c0_i32, %c0_i32_0 : i32, i32
  }
  func.func @transform_3(%arg0: i32) -> (i32, i32) {
    %c0_i32 = arith.constant 0 : i32
    %c0_i32_0 = arith.constant 0 : i32
    %c0_i32_1 = arith.constant 0 : i32
    return %c0_i32, %c0_i32_0 : i32, i32
  }
  func.func @transform_4(%arg0: i32) -> (i32, i32) {
    %c0_i32 = arith.constant 0 : i32
    %c0_i32_0 = arith.constant 0 : i32
    %c0_i32_1 = arith.constant 0 : i32
    return %c0_i32, %c0_i32_0 : i32, i32
  }
  func.func @transform_5(%arg0: i32) -> (i32, i32) {
    %c0_i32 = arith.constant 0 : i32
    %c0_i32_0 = arith.constant 0 : i32
    %c0_i32_1 = arith.constant 0 : i32
    return %c0_i32, %c0_i32_0 : i32, i32
  }
  func.func @transform_6(%arg0: i32) -> (i32, i32) {
    %c0_i32 = arith.constant 0 : i32
    %c0_i32_0 = arith.constant 0 : i32
    %c0_i32_1 = arith.constant 0 : i32
    return %c0_i32, %c0_i32_0 : i32, i32
  }
  func.func @transform_7(%arg0: i32) -> (i32, i32) {
    %c0_i32 = arith.constant 0 : i32
    %c0_i32_0 = arith.constant 0 : i32
    %c0_i32_1 = arith.constant 0 : i32
    return %c0_i32, %c0_i32_0 : i32, i32
  }
  func.func @transform_8(%arg0: i32) -> (i32, i32) {
    %c0_i32 = arith.constant 0 : i32
    %c0_i32_0 = arith.constant 0 : i32
    %c0_i32_1 = arith.constant 0 : i32
    return %c0_i32, %c0_i32_0 : i32, i32
  }
  func.func @transform_9(%arg0: i32) -> (i32, i32) {
    %c0_i32 = arith.constant 0 : i32
    %c0_i32_0 = arith.constant 0 : i32
    %c0_i32_1 = arith.constant 0 : i32
    return %c0_i32, %c0_i32_0 : i32, i32
  }
  func.func @transform_10(%arg0: i32) -> (i32, i32) {
    %c0_i32 = arith.constant 0 : i32
    %c0_i32_0 = arith.constant 0 : i32
    %c0_i32_1 = arith.constant 0 : i32
    return %c0_i32, %c0_i32_0 : i32, i32
  }
  func.func @transform_11(%arg0: i32) -> (i32, i32) {
    %c0_i32 = arith.constant 0 : i32
    %c0_i32_0 = arith.constant 0 : i32
    return %arg0, %c0_i32 : i32, i32
  }
}

</mosaic_0001>

<bundles_post_ra>
// kernel: actor_forward.1
= control target key start
LH: loop header
LB: loop body
LE: loop exit
PB: predicated region body
PF: predicated region fallthrough
CT: control target
= control target key end

     0   :  { %v1620_v3 = vmov 0.0   ;;  %s2234_s1 = inlined_call_operand.vmem [shape: f32[128,256], index: 1, kind: input, shape index: {}]   ;;  %s2235_s3 = inlined_call_operand.vmem [shape: f32[256,128], index: 3, kind: input, shape index: {}]   ;;  %s2236_s0 = inlined_call_operand.vmem [shape: f32[128,128], index: 0, kind: input, shape index: {}]   ;;  %s2237_s5 = inlined_call_operand.vmem [shape: f32[128,128], index: 5, kind: input, shape index: {}]   ;;  %s2238_s2 = inlined_call_operand.vmem [shape: f32[1,256], index: 2, kind: input, shape index: {}]   ;;  %s2239_s7 = inlined_call_operand.vmem [shape: f32[128,128], index: 7, kind: input, shape index: {}]   ;;  %s2240_s4 = inlined_call_operand.vmem [shape: f32[1,128], index: 4, kind: input, shape index: {}]   ;;  %s2241_s9 = inlined_call_operand.vmem [shape: f32[128,128], index: 9, kind: input, shape index: {}]   ;;  %s2242_s6 = inlined_call_operand.vmem [shape: f32[1,128], index: 6, kind: input, shape index: {}]   ;;  %s2243_s8 = inlined_call_operand.vmem [shape: f32[1,128], index: 8, kind: input, shape index: {}]   ;;  %s2244_s10 = inlined_call_operand.vmem [shape: f32[1,128], index: 10, kind: input, shape index: {}]   ;;  %s2245_s11 = inlined_call_operand.vmem [shape: f32[128,128], index: 11, kind: output, shape index: {}]  }
   0x1   :  { %v55_v0 = vld [vmem:[%s2234_s1 + $0x8] sm:$0xff]  ;;  %v57_v1 = vld [vmem:[%s2234_s1 + $0x18] sm:$0xff]  ;;  %v54_v2 = vld [vmem:[%s2234_s1] sm:$0xff]  ;;  %162 = vmatprep.mubr.f32.mxu0 %v1620_v3 }
   0x2   :  { %v1411_v4 = vpack.c.bf16 %v57_v1, %v55_v0  ;;  %v56_v5 = vld [vmem:[%s2234_s1 + $0x10] sm:$0xff]  ;;  %v59_v6 = vld [vmem:[%s2234_s1 + $0x28] sm:$0xff]  ;;  %v61_v7 = vld [vmem:[%s2234_s1 + $0x38] sm:$0xff] }
   0x3   :  { %v1413_v8 = vpack.c.bf16 %v56_v5, %v54_v2  ;;  %v1415_v9 = vpack.c.bf16 %v61_v7, %v59_v6  ;;  %v58_v10 = vld [vmem:[%s2234_s1 + $0x20] sm:$0xff]  ;;  %v60_v11 = vld [vmem:[%s2234_s1 + $0x30] sm:$0xff]  ;;  %v63_v12 = vld [vmem:[%s2234_s1 + $0x48] sm:$0xff] }
   0x4   :  { %1412 = vmatprep.subr.bf16.mxu0 %v1411_v4  ;;  %v65_v13 = vld [vmem:[%s2234_s1 + $0x58] sm:$0xff]  ;;  %v1417_v14 = vpack.c.bf16 %v60_v11, %v58_v10  ;;  %v62_v16 = vld [vmem:[%s2234_s1 + $0x40] sm:$0xff]  ;;  %v64_v17 = vld [vmem:[%s2234_s1 + $0x50] sm:$0xff] }
   0x5   :  { %1414 = vmatpush1.bf16.msra.mxu0 %v1413_v8  ;;  %v1419_v15 = vpack.c.bf16 %v65_v13, %v63_v12  ;;  %v67_v18 = vld [vmem:[%s2234_s1 + $0x68] sm:$0xff]  ;;  %v69_v19 = vld [vmem:[%s2234_s1 + $0x78] sm:$0xff]  ;;  %v1421_v20 = vpack.c.bf16 %v64_v17, %v62_v16  ;;  %v66_v22 = vld [vmem:[%s2234_s1 + $0x60] sm:$0xff] }
   0x6   :  { %1416 = vmatprep.subr.bf16.mxu0 %v1415_v9  ;;  %v1423_v21 = vpack.c.bf16 %v69_v19, %v67_v18  ;;  %v68_v23 = vld [vmem:[%s2234_s1 + $0x70] sm:$0xff]  ;;  %v71_v24 = vld [vmem:[%s2234_s1 + $0x88] sm:$0xff]  ;;  %v73_v25 = vld [vmem:[%s2234_s1 + $0x98] sm:$0xff] }
   0x7   :  { %v1425_v26 = vpack.c.bf16 %v68_v23, %v66_v22  ;;  %v1427_v27 = vpack.c.bf16 %v73_v25, %v71_v24  ;;  %v70_v28 = vld [vmem:[%s2234_s1 + $0x80] sm:$0xff]  ;;  %v72_v29 = vld [vmem:[%s2234_s1 + $0x90] sm:$0xff]  ;;  %v75_v30 = vld [vmem:[%s2234_s1 + $0xa8] sm:$0xff] }
   0x8   :  { %v77_v31 = vld [vmem:[%s2234_s1 + $0xb8] sm:$0xff]  ;;  %v74_v32 = vld [vmem:[%s2234_s1 + $0xa0] sm:$0xff]  ;;  %v76_v33 = vld [vmem:[%s2234_s1 + $0xb0] sm:$0xff]  ;;  %v1429_v34 = vpack.c.bf16 %v72_v29, %v70_v28 }
   0x9   :  { %1418 = vmatpush1.bf16.msra.mxu0 %v1417_v14  ;;  %v79_v35 = vld [vmem:[%s2234_s1 + $0xc8] sm:$0xff]  ;;  %v81_v36 = vld [vmem:[%s2234_s1 + $0xd8] sm:$0xff]  ;;  %v307_v37 = vld [vmem:[%s2235_s3 + $0x80] sm:$0xff]  ;;  %v1431_v40 = vpack.c.bf16 %v77_v31, %v75_v30  ;;  %v1433_v51 = vpack.c.bf16 %v76_v33, %v74_v32 }
   0xa   :  { %1420 = vmatprep.subr.bf16.mxu0 %v1419_v15  ;;  %v308_v38 = vld [vmem:[%s2235_s3 + $0x88] sm:$0xff]  ;;  %v291_v39 = vld [vmem:[%s2235_s3] sm:$0xff]  ;;  %v309_v43 = vld [vmem:[%s2235_s3 + $0x90] sm:$0xff]  ;;  %v1435_v55 = vpack.c.bf16 %v81_v36, %v79_v35 }
   0xb   :  { %v1443_v41 = vpack.c.bf16 %v308_v38, %v307_v37  ;;  %v292_v42 = vld [vmem:[%s2235_s3 + $0x8] sm:$0xff]  ;;  %v310_v44 = vld [vmem:[%s2235_s3 + $0x98] sm:$0xff]  ;;  %v293_v47 = vld [vmem:[%s2235_s3 + $0x10] sm:$0xff] }
   0xc   :  { %v1445_v45 = vpack.c.bf16 %v292_v42, %v291_v39  ;;  %v1447_v46 = vpack.c.bf16 %v310_v44, %v309_v43  ;;  %v294_v48 = vld [vmem:[%s2235_s3 + $0x18] sm:$0xff]  ;;  %v311_v49 = vld [vmem:[%s2235_s3 + $0xa0] sm:$0xff]  ;;  %v312_v50 = vld [vmem:[%s2235_s3 + $0xa8] sm:$0xff] }
   0xd   :  { %1422 = vmatpush1.bf16.msra.mxu0 %v1421_v20  ;;  %1444 = vmatprep.subr.bf16.mxu1 %v1443_v41  ;;  %v78_v52 = vld [vmem:[%s2234_s1 + $0xc0] sm:$0xff]  ;;  %v80_v53 = vld [vmem:[%s2234_s1 + $0xd0] sm:$0xff]  ;;  %v1449_v54 = vpack.c.bf16 %v294_v48, %v293_v47  ;;  %v83_v56 = vld [vmem:[%s2234_s1 + $0xe8] sm:$0xff]  ;;  %v1451_v57 = vpack.c.bf16 %v312_v50, %v311_v49 }
   0xe   :  { %1424 = vmatprep.subr.bf16.mxu0 %v1423_v21  ;;  %1446 = vmatpush3.bf16.msra.mxu1 %v1445_v45  ;;  %v295_v58 = vld [vmem:[%s2235_s3 + $0x20] sm:$0xff]  ;;  %v296_v59 = vld [vmem:[%s2235_s3 + $0x28] sm:$0xff]  ;;  %v85_v60 = vld [vmem:[%s2234_s1 + $0xf8] sm:$0xff]  ;;  %v1437_v63 = vpack.c.bf16 %v80_v53, %v78_v52 }
   0xf   :  { %1448 = vmatprep.subr.bf16.mxu1 %v1447_v46  ;;  %v313_v61 = vld [vmem:[%s2235_s3 + $0xb0] sm:$0xff]  ;;  %v314_v62 = vld [vmem:[%s2235_s3 + $0xb8] sm:$0xff]  ;;  %v82_v0 = vld [vmem:[%s2234_s1 + $0xe0] sm:$0xff]  ;;  %v1453_v1 = vpack.c.bf16 %v296_v59, %v295_v58  ;;  %v1439_v2 = vpack.c.bf16 %v85_v60, %v83_v56 }
  0x10   :  { %v84_v4 = vld [vmem:[%s2234_s1 + $0xf0] sm:$0xff]  ;;  %v1455_v5 = vpack.c.bf16 %v314_v62, %v313_v61  ;;  %v298_v7 = vld [vmem:[%s2235_s3 + $0x38] sm:$0xff]  ;;  %v315_v8 = vld [vmem:[%s2235_s3 + $0xc0] sm:$0xff] }
  0x11   :  { %1426 = vmatpush1.bf16.msra.mxu0 %v1425_v26  ;;  %v297_v6 = vld [vmem:[%s2235_s3 + $0x30] sm:$0xff]  ;;  %v316_v9 = vld [vmem:[%s2235_s3 + $0xc8] sm:$0xff]  ;;  %v1441_v10 = vpack.c.bf16 %v84_v4, %v82_v0  ;;  %v299_v13 = vld [vmem:[%s2235_s3 + $0x40] sm:$0xff]  ;;  %v88_v0 = vlaneseq }
  0x12   :  { %1428 = vmatprep.subr.bf16.mxu0 %v1427_v27  ;;  %1450 = vmatpush3.bf16.msra.mxu1 %v1449_v54  ;;  %v1457_v11 = vpack.c.bf16 %v298_v7, %v297_v6  ;;  %v1459_v12 = vpack.c.bf16 %v316_v9, %v315_v8  ;;  %v300_v14 = vld [vmem:[%s2235_s3 + $0x48] sm:$0xff]  ;;  %v317_v15 = vld [vmem:[%s2235_s3 + $0xd0] sm:$0xff]  ;;  %v318_v16 = vld [vmem:[%s2235_s3 + $0xd8] sm:$0xff] }
  0x13   :  { %1452 = vmatprep.subr.bf16.mxu1 %v1451_v57  ;;  %v38_v17 = vld [vmem:[%s2236_s0] sm:$0xff]  ;;  %v1461_v18 = vpack.c.bf16 %v300_v14, %v299_v13  ;;  %v1463_v19 = vpack.c.bf16 %v318_v16, %v317_v15  ;;  %v301_v20 = vld [vmem:[%s2235_s3 + $0x50] sm:$0xff]  ;;  %v302_v21 = vld [vmem:[%s2235_s3 + $0x58] sm:$0xff] }
  0x14   :  { %v319_v22 = vld [vmem:[%s2235_s3 + $0xe0] sm:$0xff]  ;;  %v320_v23 = vld [vmem:[%s2235_s3 + $0xe8] sm:$0xff]  ;;  %v1465_v25 = vpack.c.bf16 %v302_v21, %v301_v20  ;;  %v40_v27 = vld [vmem:[%s2236_s0 + $0x10] sm:$0xff] }
  0x15   :  { %1430 = vmatpush1.bf16.msra.mxu0 %v1429_v34  ;;  %v39_v24 = vld [vmem:[%s2236_s0 + $0x8] sm:$0xff]  ;;  %v1467_v26 = vpack.c.bf16 %v320_v23, %v319_v22  ;;  %v41_v28 = vld [vmem:[%s2236_s0 + $0x18] sm:$0xff]  ;;  %v42_v29 = vld [vmem:[%s2236_s0 + $0x20] sm:$0xff] }
  0x16   :  { %1432 = vmatprep.subr.bf16.mxu0 %v1431_v40  ;;  %1454 = vmatpush3.bf16.msra.mxu1 %v1453_v1  ;;  %v43_v30 = vld [vmem:[%s2236_s0 + $0x28] sm:$0xff]  ;;  %v44_v31 = vld [vmem:[%s2236_s0 + $0x30] sm:$0xff]  ;;  %v45_v32 = vld [vmem:[%s2236_s0 + $0x38] sm:$0xff]  ;;  %v89_v1 = vshrl.u32 %v88_v0, 7 }
  0x17   :  { %1456 = vmatprep.subr.bf16.mxu1 %v1455_v5  ;;  %v46_v33 = vld [vmem:[%s2236_s0 + $0x40] sm:$0xff]  ;;  %v47_v34 = vld [vmem:[%s2236_s0 + $0x48] sm:$0xff]  ;;  %v48_v35 = vld [vmem:[%s2236_s0 + $0x50] sm:$0xff] }
  0x18   :  { %v49_v36 = vld [vmem:[%s2236_s0 + $0x58] sm:$0xff]  ;;  %v50_v37 = vld [vmem:[%s2236_s0 + $0x60] sm:$0xff]  ;;  %v51_v38 = vld [vmem:[%s2236_s0 + $0x68] sm:$0xff]  ;;  %v94_v5 = vsub.s32 1, %v89_v1 }
  0x19   :  { %1434 = vmatpush1.bf16.msra.mxu0 %v1433_v51  ;;  %v52_v39 = vld [vmem:[%s2236_s0 + $0x70] sm:$0xff]  ;;  %v53_v40 = vld [vmem:[%s2236_s0 + $0x78] sm:$0xff]  ;;  %v303_v41 = vld [vmem:[%s2235_s3 + $0x60] sm:$0xff] }
  0x1a   :  { %1436 = vmatprep.subr.bf16.mxu0 %v1435_v55  ;;  %1458 = vmatpush3.bf16.msra.mxu1 %v1457_v11  ;;  %v304_v42 = vld [vmem:[%s2235_s3 + $0x68] sm:$0xff]  ;;  %v321_v44 = vld [vmem:[%s2235_s3 + $0xf0] sm:$0xff]  ;;  %v306_v47 = vld [vmem:[%s2235_s3 + $0x78] sm:$0xff] }
  0x1b   :  { %1460 = vmatprep.subr.bf16.mxu1 %v1459_v12  ;;  %v1469_v43 = vpack.c.bf16 %v304_v42, %v303_v41  ;;  %v305_v46 = vld [vmem:[%s2235_s3 + $0x70] sm:$0xff]  ;;  %v491_v49 = vld [vmem:[%s2237_s5] sm:$0xff]  ;;  %v492_v50 = vld [vmem:[%s2237_s5 + $0x8] sm:$0xff] }
  0x1c   :  { %v1473_v48 = vpack.c.bf16 %v306_v47, %v305_v46  ;;  %v493_v51 = vld [vmem:[%s2237_s5 + $0x10] sm:$0xff]  ;;  %v1475_v52 = vpack.c.bf16 %v492_v50, %v491_v49  ;;  %v494_v53 = vld [vmem:[%s2237_s5 + $0x18] sm:$0xff]  ;;  %v495_v55 = vld [vmem:[%s2237_s5 + $0x20] sm:$0xff] }
  0x1d   :  { %1438 = vmatpush1.bf16.msra.mxu0 %v1437_v63  ;;  %v1479_v54 = vpack.c.bf16 %v494_v53, %v493_v51  ;;  %v496_v56 = vld [vmem:[%s2237_s5 + $0x28] sm:$0xff]  ;;  %v497_v58 = vld [vmem:[%s2237_s5 + $0x30] sm:$0xff]  ;;  %v498_v59 = vld [vmem:[%s2237_s5 + $0x38] sm:$0xff] }
  0x1e   :  { %1440 = vmatprep.subr.bf16.mxu0 %v1439_v2  ;;  %1462 = vmatpush3.bf16.msra.mxu1 %v1461_v18  ;;  %v1483_v57 = vpack.c.bf16 %v496_v56, %v495_v55  ;;  %v1487_v60 = vpack.c.bf16 %v498_v59, %v497_v58  ;;  %v499_v61 = vld [vmem:[%s2237_s5 + $0x40] sm:$0xff]  ;;  %v500_v62 = vld [vmem:[%s2237_s5 + $0x48] sm:$0xff]  ;;  %v90_v2 = vsub.s32 0, %v89_v1 }
  0x1f   :  { %1464 = vmatprep.subr.bf16.mxu1 %v1463_v19  ;;  %v1491_v63 = vpack.c.bf16 %v500_v62, %v499_v61  ;;  %v86_v4 = vld [vmem:[%s2238_s2] sm:$0x3] }
  0x20   :  { %v1970_v6 = vrot.slane %v86_v4, %v90_v2  ;;  %v1972_v7 = vrot.slane %v86_v4, %v94_v5 }
  0x21   :  { %1442 = vmatpush1.bf16.msra.mxu0 %v1441_v10 }
  0x22   :  { %1466 = vmatpush3.bf16.msra.mxu1 %v1465_v25  ;;  %1476 = vmatprep.subr.bf16.mxu0 %v1475_v52 }
  0x23   :  { %1468 = vmatprep.subr.bf16.mxu1 %v1467_v26 }
  0x24   :  { %163 = vmatmul.mubr.f32.vlgmr.msra.gmra.mrb[0].mxu0 %v38_v17 }
  0x25   :  { %168 = vmatprep.mubr.f32.mxu0 %v1620_v3  ;;  %1478 = vmatpush3.bf16.msra.mxu0 %v1475_v52 }
  0x26   :  { %1470 = vmatpush3.bf16.msra.mxu1 %v1469_v43  ;;  %1480 = vmatprep.subr.bf16.mxu0 %v1479_v54 }
  0x28   :  { %169 = vmatmul.mubr.f32.gmra.mrb[2].mxu0 %v39_v24 }
  0x29   :  { %174 = vmatprep.mubr.f32.mxu0 %v1620_v3  ;;  %1482 = vmatpush3.bf16.msra.mxu0 %v1479_v54 }
  0x2a   :  { %1484 = vmatprep.subr.bf16.mxu0 %v1483_v57 }
  0x2c   :  { %175 = vmatmul.mubr.f32.gmra.mrb[4].mxu0 %v40_v27 }
  0x2d   :  { %180 = vmatprep.mubr.f32.mxu0 %v1620_v3  ;;  %1486 = vmatpush3.bf16.msra.mxu0 %v1483_v57 }
  0x2e   :  { %1488 = vmatprep.subr.bf16.mxu0 %v1487_v60 }
  0x30   :  { %181 = vmatmul.mubr.f32.gmra.mrb[6].mxu0 %v41_v28 }
  0x31   :  { %186 = vmatprep.mubr.f32.mxu0 %v1620_v3  ;;  %1490 = vmatpush3.bf16.msra.mxu0 %v1487_v60 }
  0x32   :  { %1492 = vmatprep.subr.bf16.mxu0 %v1491_v63 }
  0x34   :  { %187 = vmatmul.mubr.f32.gmra.mrb[8].mxu0 %v42_v29 }
  0x35   :  { %192 = vmatprep.mubr.f32.mxu0 %v1620_v3  ;;  %1494 = vmatpush3.bf16.msra.mxu0 %v1491_v63 }
  0x38   :  { %193 = vmatmul.mubr.f32.gmra.mrb[10].mxu0 %v43_v30 }
  0x39   :  { %198 = vmatprep.mubr.f32.mxu0 %v1620_v3 }
  0x3c   :  { %199 = vmatmul.mubr.f32.gmra.mrb[12].mxu0 %v44_v31 }
  0x3d   :  { %204 = vmatprep.mubr.f32.mxu0 %v1620_v3 }
  0x40   :  { %205 = vmatmul.mubr.f32.gmra.mrb[14].mxu0 %v45_v32 }
  0x41   :  { %210 = vmatprep.mubr.f32.mxu0 %v1620_v3 }
  0x44   :  { %211 = vmatmul.mubr.f32.gmra.mrb[16].mxu0 %v46_v33 }
  0x45   :  { %216 = vmatprep.mubr.f32.mxu0 %v1620_v3 }
  0x48   :  { %217 = vmatmul.mubr.f32.gmra.mrb[18].mxu0 %v47_v34 }
  0x49   :  { %222 = vmatprep.mubr.f32.mxu0 %v1620_v3 }
  0x4c   :  { %223 = vmatmul.mubr.f32.gmra.mrb[20].mxu0 %v48_v35 }
  0x4d   :  { %228 = vmatprep.mubr.f32.mxu0 %v1620_v3 }
  0x50   :  { %229 = vmatmul.mubr.f32.gmra.mrb[22].mxu0 %v49_v36 }
  0x51   :  { %234 = vmatprep.mubr.f32.mxu0 %v1620_v3 }
  0x54   :  { %235 = vmatmul.mubr.f32.gmra.mrb[24].mxu0 %v50_v37 }
  0x55   :  { %240 = vmatprep.mubr.f32.mxu0 %v1620_v3 }
  0x58   :  { %241 = vmatmul.mubr.f32.gmra.mrb[26].mxu0 %v51_v38 }
  0x59   :  { %246 = vmatprep.mubr.f32.mxu0 %v1620_v3 }
  0x5c   :  { %247 = vmatmul.mubr.f32.gmra.mrb[28].mxu0 %v52_v39 }
  0x5d   :  { %252 = vmatprep.mubr.f32.mxu0 %v1620_v3  ;;  %v322_v3 = vld [vmem:[%s2235_s3 + $0xf8] sm:$0xff] }
  0x5e   :  { %v1471_v45 = vpack.c.bf16 %v322_v3, %v321_v44 }
  0x60   :  { %253 = vmatmul.mubr.f32.gmra.mrb[30].mxu0 %v53_v40  ;;  %1472 = vmatprep.subr.bf16.mxu1 %v1471_v45 }
  0x61   :  { %1474 = vmatpush3.bf16.msra.mxu1 %v1473_v48 }
  0xf7   :  { %v164_v8 = vpop.f32.mrb[0].mxu0 }
  0xf8   :  { %v165_v9 = vadd.f32 %v164_v8, %v1970_v6  ;;  %v166_v10 = vpop.f32.mrb[1].mxu0 }
  0xf9   :  { %v167_v11 = vadd.f32 %v166_v10, %v1972_v7 }
  0xfa   :  { %v259_v14 = vmax.f32 %v165_v9, 0.0 }
  0xfb   :  { %v170_v12 = vpop.f32.mrb[2].mxu0  ;;  %v260_v13 = vmax.f32 %v167_v11, 0.0 }
  0xfc   :  { %v171_v15 = vadd.f32 %v170_v12, %v1970_v6  ;;  %v172_v16 = vpop.f32.mrb[3].mxu0 }
  0xfd   :  { %v173_v17 = vadd.f32 %v172_v16, %v1972_v7  ;;  %394 = vmatprep.mubr.f32.mxu1 %v260_v13 }
  0xfe   :  { %395 = vmatmul.mubr.f32.vlgmr.msra.gmra.mrb[0].mxu1 %v259_v14  ;;  %v261_v20 = vmax.f32 %v171_v15, 0.0 }
  0xff   :  { %v262_v18 = vmax.f32 %v173_v17, 0.0  ;;  %v176_v19 = vpop.f32.mrb[4].mxu0 }
 0x100   :  { %v177_v21 = vadd.f32 %v176_v19, %v1970_v6  ;;  %v178_v22 = vpop.f32.mrb[5].mxu0 }
 0x101   :  { %v179_v23 = vadd.f32 %v178_v22, %v1972_v7  ;;  %399 = vmatprep.mubr.f32.mxu1 %v262_v18 }
 0x102   :  { %400 = vmatmul.mubr.f32.gmra.mrb[2].mxu1 %v261_v20  ;;  %v263_v26 = vmax.f32 %v177_v21, 0.0 }
 0x103   :  { %v264_v24 = vmax.f32 %v179_v23, 0.0  ;;  %v182_v25 = vpop.f32.mrb[6].mxu0 }
 0x104   :  { %v183_v27 = vadd.f32 %v182_v25, %v1970_v6  ;;  %v184_v28 = vpop.f32.mrb[7].mxu0 }
 0x105   :  { %v185_v29 = vadd.f32 %v184_v28, %v1972_v7  ;;  %404 = vmatprep.mubr.f32.mxu1 %v264_v24 }
 0x106   :  { %405 = vmatmul.mubr.f32.gmra.mrb[4].mxu1 %v263_v26  ;;  %v265_v32 = vmax.f32 %v183_v27, 0.0 }
 0x107   :  { %v266_v30 = vmax.f32 %v185_v29, 0.0  ;;  %v188_v31 = vpop.f32.mrb[8].mxu0 }
 0x108   :  { %v189_v33 = vadd.f32 %v188_v31, %v1970_v6  ;;  %v190_v34 = vpop.f32.mrb[9].mxu0 }
 0x109   :  { %v191_v35 = vadd.f32 %v190_v34, %v1972_v7  ;;  %409 = vmatprep.mubr.f32.mxu1 %v266_v30 }
 0x10a   :  { %410 = vmatmul.mubr.f32.gmra.mrb[6].mxu1 %v265_v32  ;;  %v267_v38 = vmax.f32 %v189_v33, 0.0 }
 0x10b   :  { %v268_v36 = vmax.f32 %v191_v35, 0.0  ;;  %v194_v37 = vpop.f32.mrb[10].mxu0 }
 0x10c   :  { %v195_v39 = vadd.f32 %v194_v37, %v1970_v6  ;;  %v196_v40 = vpop.f32.mrb[11].mxu0 }
 0x10d   :  { %v197_v41 = vadd.f32 %v196_v40, %v1972_v7  ;;  %414 = vmatprep.mubr.f32.mxu1 %v268_v36 }
 0x10e   :  { %415 = vmatmul.mubr.f32.gmra.mrb[8].mxu1 %v267_v38  ;;  %v269_v44 = vmax.f32 %v195_v39, 0.0 }
 0x10f   :  { %v270_v42 = vmax.f32 %v197_v41, 0.0  ;;  %v200_v43 = vpop.f32.mrb[12].mxu0 }
 0x110   :  { %v201_v3 = vadd.f32 %v200_v43, %v1970_v6  ;;  %v202_v45 = vpop.f32.mrb[13].mxu0  ;;  %v502_v43 = vld [vmem:[%s2237_s5 + $0x58] sm:$0xff] }
 0x111   :  { %v203_v46 = vadd.f32 %v202_v45, %v1972_v7  ;;  %419 = vmatprep.mubr.f32.mxu1 %v270_v42  ;;  %v501_v42 = vld [vmem:[%s2237_s5 + $0x50] sm:$0xff] }
 0x112   :  { %420 = vmatmul.mubr.f32.gmra.mrb[10].mxu1 %v269_v44  ;;  %v271_v49 = vmax.f32 %v201_v3, 0.0  ;;  %v1495_v44 = vpack.c.bf16 %v502_v43, %v501_v42  ;;  %v505_v45 = vld [vmem:[%s2237_s5 + $0x70] sm:$0xff] }
 0x113   :  { %v272_v47 = vmax.f32 %v203_v46, 0.0  ;;  %v206_v48 = vpop.f32.mrb[14].mxu0  ;;  %v506_v46 = vld [vmem:[%s2237_s5 + $0x78] sm:$0xff] }
 0x114   :  { %v207_v50 = vadd.f32 %v206_v48, %v1970_v6  ;;  %v208_v51 = vpop.f32.mrb[15].mxu0  ;;  %1496 = vmatprep.subr.bf16.mxu0 %v1495_v44  ;;  %v675_v48 = vld [vmem:[%s2239_s7] sm:$0xff] }
 0x115   :  { %v209_v52 = vadd.f32 %v208_v51, %v1972_v7  ;;  %424 = vmatprep.mubr.f32.mxu1 %v272_v47  ;;  %1498 = vmatpush3.bf16.msra.mxu0 %v1495_v44  ;;  %v1503_v47 = vpack.c.bf16 %v506_v46, %v505_v45 }
 0x116   :  { %425 = vmatmul.mubr.f32.gmra.mrb[12].mxu1 %v271_v49  ;;  %v273_v55 = vmax.f32 %v207_v50, 0.0  ;;  %v676_v49 = vld [vmem:[%s2239_s7 + $0x8] sm:$0xff]  ;;  %v677_v50 = vld [vmem:[%s2239_s7 + $0x10] sm:$0xff] }
 0x117   :  { %v274_v53 = vmax.f32 %v209_v52, 0.0  ;;  %v212_v54 = vpop.f32.mrb[16].mxu0  ;;  %v1507_v51 = vpack.c.bf16 %v676_v49, %v675_v48  ;;  %v678_v52 = vld [vmem:[%s2239_s7 + $0x18] sm:$0xff] }
 0x118   :  { %v213_v56 = vadd.f32 %v212_v54, %v1970_v6  ;;  %v214_v57 = vpop.f32.mrb[17].mxu0  ;;  %v679_v54 = vld [vmem:[%s2239_s7 + $0x20] sm:$0xff] }
 0x119   :  { %v215_v58 = vadd.f32 %v214_v57, %v1972_v7  ;;  %429 = vmatprep.mubr.f32.mxu1 %v274_v53  ;;  %v1511_v53 = vpack.c.bf16 %v678_v52, %v677_v50  ;;  %1508 = vmatprep.subr.bf16.mxu1 %v1507_v51  ;;  %v681_v57 = vld [vmem:[%s2239_s7 + $0x30] sm:$0xff] }
 0x11a   :  { %430 = vmatmul.mubr.f32.gmra.mrb[14].mxu1 %v273_v55  ;;  %v275_v61 = vmax.f32 %v213_v56, 0.0  ;;  %v680_v55 = vld [vmem:[%s2239_s7 + $0x28] sm:$0xff] }
 0x11b   :  { %v276_v59 = vmax.f32 %v215_v58, 0.0  ;;  %v218_v60 = vpop.f32.mrb[18].mxu0  ;;  %1510 = vmatpush3.bf16.msra.mxu1 %v1507_v51  ;;  %v1515_v56 = vpack.c.bf16 %v680_v55, %v679_v54  ;;  %v682_v58 = vld [vmem:[%s2239_s7 + $0x38] sm:$0xff] }
 0x11c   :  { %v219_v62 = vadd.f32 %v218_v60, %v1970_v6  ;;  %v220_v63 = vpop.f32.mrb[19].mxu0  ;;  %1512 = vmatprep.subr.bf16.mxu1 %v1511_v53  ;;  %v683_v60 = vld [vmem:[%s2239_s7 + $0x40] sm:$0xff] }
 0x11d   :  { %v221_v0 = vadd.f32 %v220_v63, %v1972_v7  ;;  %434 = vmatprep.mubr.f32.mxu1 %v276_v59  ;;  %v1519_v59 = vpack.c.bf16 %v682_v58, %v681_v57  ;;  %v685_v63 = vld [vmem:[%s2239_s7 + $0x50] sm:$0xff] }
 0x11e   :  { %435 = vmatmul.mubr.f32.gmra.mrb[16].mxu1 %v275_v61  ;;  %v277_v4 = vmax.f32 %v219_v62, 0.0  ;;  %v684_v61 = vld [vmem:[%s2239_s7 + $0x48] sm:$0xff] }
 0x11f   :  { %v278_v1 = vmax.f32 %v221_v0, 0.0  ;;  %v224_v2 = vpop.f32.mrb[20].mxu0  ;;  %1514 = vmatpush3.bf16.msra.mxu1 %v1511_v53  ;;  %v1523_v62 = vpack.c.bf16 %v684_v61, %v683_v60  ;;  %v686_v0 = vld [vmem:[%s2239_s7 + $0x58] sm:$0xff] }
 0x120   :  { %v225_v5 = vadd.f32 %v224_v2, %v1970_v6  ;;  %v226_v8 = vpop.f32.mrb[21].mxu0  ;;  %1516 = vmatprep.subr.bf16.mxu1 %v1515_v56  ;;  %v687_v2 = vld [vmem:[%s2239_s7 + $0x60] sm:$0xff] }
 0x121   :  { %v227_v9 = vadd.f32 %v226_v8, %v1972_v7  ;;  %439 = vmatprep.mubr.f32.mxu1 %v278_v1  ;;  %v1527_v1 = vpack.c.bf16 %v686_v0, %v685_v63 }
 0x122   :  { %440 = vmatmul.mubr.f32.gmra.mrb[18].mxu1 %v277_v4  ;;  %v279_v12 = vmax.f32 %v225_v5, 0.0  ;;  %v688_v4 = vld [vmem:[%s2239_s7 + $0x68] sm:$0xff] }
 0x123   :  { %v280_v10 = vmax.f32 %v227_v9, 0.0  ;;  %v230_v11 = vpop.f32.mrb[22].mxu0  ;;  %1518 = vmatpush3.bf16.msra.mxu1 %v1515_v56  ;;  %v1531_v5 = vpack.c.bf16 %v688_v4, %v687_v2  ;;  %v2069_v9 = vld [vmem:[%s2240_s4] ss:$0 sm:$0xff] }
 0x124   :  { %v231_v13 = vadd.f32 %v230_v11, %v1970_v6  ;;  %v232_v14 = vpop.f32.mrb[23].mxu0  ;;  %1520 = vmatprep.subr.bf16.mxu1 %v1519_v59 }
 0x125   :  { %v233_v15 = vadd.f32 %v232_v14, %v1972_v7  ;;  %444 = vmatprep.mubr.f32.mxu1 %v280_v10 }
 0x126   :  { %445 = vmatmul.mubr.f32.gmra.mrb[20].mxu1 %v279_v12  ;;  %v281_v18 = vmax.f32 %v231_v13, 0.0 }
 0x127   :  { %v282_v16 = vmax.f32 %v233_v15, 0.0  ;;  %v236_v17 = vpop.f32.mrb[24].mxu0  ;;  %1522 = vmatpush3.bf16.msra.mxu1 %v1519_v59 }
 0x128   :  { %v237_v19 = vadd.f32 %v236_v17, %v1970_v6  ;;  %v238_v20 = vpop.f32.mrb[25].mxu0  ;;  %1524 = vmatprep.subr.bf16.mxu1 %v1523_v62 }
 0x129   :  { %v239_v21 = vadd.f32 %v238_v20, %v1972_v7  ;;  %449 = vmatprep.mubr.f32.mxu1 %v282_v16 }
 0x12a   :  { %450 = vmatmul.mubr.f32.gmra.mrb[22].mxu1 %v281_v18  ;;  %v283_v24 = vmax.f32 %v237_v19, 0.0 }
 0x12b   :  { %v284_v22 = vmax.f32 %v239_v21, 0.0  ;;  %v242_v23 = vpop.f32.mrb[26].mxu0  ;;  %1526 = vmatpush3.bf16.msra.mxu1 %v1523_v62 }
 0x12c   :  { %v243_v25 = vadd.f32 %v242_v23, %v1970_v6  ;;  %v244_v26 = vpop.f32.mrb[27].mxu0  ;;  %1528 = vmatprep.subr.bf16.mxu1 %v1527_v1 }
 0x12d   :  { %v245_v27 = vadd.f32 %v244_v26, %v1972_v7  ;;  %454 = vmatprep.mubr.f32.mxu1 %v284_v22 }
 0x12e   :  { %455 = vmatmul.mubr.f32.gmra.mrb[24].mxu1 %v283_v24  ;;  %v285_v30 = vmax.f32 %v243_v25, 0.0 }
 0x12f   :  { %v286_v28 = vmax.f32 %v245_v27, 0.0  ;;  %v248_v29 = vpop.f32.mrb[28].mxu0  ;;  %1530 = vmatpush3.bf16.msra.mxu1 %v1527_v1 }
 0x130   :  { %v249_v31 = vadd.f32 %v248_v29, %v1970_v6  ;;  %v250_v32 = vpop.f32.mrb[29].mxu0  ;;  %1532 = vmatprep.subr.bf16.mxu1 %v1531_v5 }
 0x131   :  { %v251_v33 = vadd.f32 %v250_v32, %v1972_v7  ;;  %459 = vmatprep.mubr.f32.mxu1 %v286_v28 }
 0x132   :  { %460 = vmatmul.mubr.f32.gmra.mrb[26].mxu1 %v285_v30  ;;  %v287_v36 = vmax.f32 %v249_v31, 0.0 }
 0x133   :  { %v288_v34 = vmax.f32 %v251_v33, 0.0  ;;  %v254_v35 = vpop.f32.mrb[30].mxu0  ;;  %1534 = vmatpush3.bf16.msra.mxu1 %v1531_v5 }
 0x134   :  { %v255_v37 = vadd.f32 %v254_v35, %v1970_v6  ;;  %v256_v38 = vpop.f32.mrb[31].mxu0  ;;  %v503_v6 = vld [vmem:[%s2237_s5 + $0x60] sm:$0xff] }
 0x135   :  { %v257_v39 = vadd.f32 %v256_v38, %v1972_v7  ;;  %464 = vmatprep.mubr.f32.mxu1 %v288_v34  ;;  %v504_v7 = vld [vmem:[%s2237_s5 + $0x68] sm:$0xff] }
 0x136   :  { %465 = vmatmul.mubr.f32.gmra.mrb[28].mxu1 %v287_v36  ;;  %v289_v41 = vmax.f32 %v255_v37, 0.0  ;;  %v1499_v3 = vpack.c.bf16 %v504_v7, %v503_v6 }
 0x137   :  { %v290_v40 = vmax.f32 %v257_v39, 0.0 }
 0x138   :  { %1500 = vmatprep.subr.bf16.mxu0 %v1499_v3 }
 0x139   :  { %469 = vmatprep.mubr.f32.mxu1 %v290_v40  ;;  %1502 = vmatpush3.bf16.msra.mxu0 %v1499_v3 }
 0x13a   :  { %470 = vmatmul.mubr.f32.gmra.mrb[30].mxu1 %v289_v41  ;;  %1504 = vmatprep.subr.bf16.mxu0 %v1503_v47 }
 0x13d   :  { %1506 = vmatpush3.bf16.msra.mxu0 %v1503_v47 }
 0x1d1   :  { %v1099_v8 = vpop.f32.mrb[0].mxu1 }
 0x1d2   :  { %v1100_v10 = vpop.f32.mrb[1].mxu1 }
 0x1d3   :  { %v1101_v11 = vadd.f32 %v1100_v10, %v1099_v8 }
 0x1d5   :  { %v397_v12 = vadd.f32 %v1101_v11, %v2069_v9  ;;  %v1102_v13 = vpop.f32.mrb[2].mxu1 }
 0x1d6   :  { %v1103_v14 = vpop.f32.mrb[3].mxu1 }
 0x1d7   :  { %v475_v15 = vmax.f32 %v397_v12, 0.0  ;;  %v1104_v16 = vadd.f32 %v1103_v14, %v1102_v13 }
 0x1d9   :  { %v402_v17 = vadd.f32 %v1104_v16, %v2069_v9  ;;  %v1105_v18 = vpop.f32.mrb[4].mxu1  ;;  %1275 = vmatprep.mubr.f32.mxu0 %v475_v15 }
 0x1da   :  { %v1106_v19 = vpop.f32.mrb[5].mxu1 }
 0x1db   :  { %v476_v20 = vmax.f32 %v402_v17, 0.0  ;;  %v1107_v21 = vadd.f32 %v1106_v19, %v1105_v18 }
 0x1dd   :  { %v407_v22 = vadd.f32 %v1107_v21, %v2069_v9  ;;  %v1108_v23 = vpop.f32.mrb[6].mxu1  ;;  %1276 = vmatmul.mubr.f32.vlgmr.msra.gmra.mrb[32].mxu0 %v476_v20 }
 0x1de   :  { %v1109_v24 = vpop.f32.mrb[7].mxu1 }
 0x1df   :  { %v477_v25 = vmax.f32 %v407_v22, 0.0  ;;  %v1110_v26 = vadd.f32 %v1109_v24, %v1108_v23 }
 0x1e1   :  { %v412_v27 = vadd.f32 %v1110_v26, %v2069_v9  ;;  %v1111_v28 = vpop.f32.mrb[8].mxu1  ;;  %1278 = vmatprep.mubr.f32.mxu0 %v477_v25  ;;  %v689_v26 = vld [vmem:[%s2239_s7 + $0x70] sm:$0xff] }
 0x1e2   :  { %v1112_v29 = vpop.f32.mrb[9].mxu1 }
 0x1e3   :  { %v478_v30 = vmax.f32 %v412_v27, 0.0  ;;  %v1113_v31 = vadd.f32 %v1112_v29, %v1111_v28  ;;  %v690_v27 = vld [vmem:[%s2239_s7 + $0x78] sm:$0xff]  ;;  %v859_v29 = vld [vmem:[%s2241_s9] sm:$0xff] }
 0x1e4   :  { %v1535_v28 = vpack.c.bf16 %v690_v27, %v689_v26 }
 0x1e5   :  { %v417_v32 = vadd.f32 %v1113_v31, %v2069_v9  ;;  %v1114_v33 = vpop.f32.mrb[10].mxu1  ;;  %1279 = vmatmul.mubr.f32.gmra.mrb[34].mxu0 %v478_v30  ;;  %v861_v30 = vld [vmem:[%s2241_s9 + $0x10] sm:$0xff] }
 0x1e6   :  { %v1115_v34 = vpop.f32.mrb[11].mxu1  ;;  %1536 = vmatprep.subr.bf16.mxu1 %v1535_v28 }
 0x1e7   :  { %v479_v35 = vmax.f32 %v417_v32, 0.0  ;;  %v1116_v36 = vadd.f32 %v1115_v34, %v1114_v33  ;;  %1538 = vmatpush3.bf16.msra.mxu1 %v1535_v28  ;;  %v862_v32 = vld [vmem:[%s2241_s9 + $0x18] sm:$0xff]  ;;  %v863_v34 = vld [vmem:[%s2241_s9 + $0x20] sm:$0xff] }
 0x1e8   :  { %v1543_v33 = vpack.c.bf16 %v862_v32, %v861_v30 }
 0x1e9   :  { %v422_v37 = vadd.f32 %v1116_v36, %v2069_v9  ;;  %v1117_v38 = vpop.f32.mrb[12].mxu1  ;;  %1281 = vmatprep.mubr.f32.mxu0 %v479_v35  ;;  %v864_v35 = vld [vmem:[%s2241_s9 + $0x28] sm:$0xff] }
 0x1ea   :  { %v1118_v39 = vpop.f32.mrb[13].mxu1  ;;  %v1547_v36 = vpack.c.bf16 %v864_v35, %v863_v34  ;;  %v873_v34 = vld [vmem:[%s2241_s9 + $0x70] sm:$0xff]  ;;  %v874_v35 = vld [vmem:[%s2241_s9 + $0x78] sm:$0xff] }
 0x1eb   :  { %v480_v40 = vmax.f32 %v422_v37, 0.0  ;;  %v1119_v41 = vadd.f32 %v1118_v39, %v1117_v38  ;;  %v865_v37 = vld [vmem:[%s2241_s9 + $0x30] sm:$0xff]  ;;  %v866_v38 = vld [vmem:[%s2241_s9 + $0x38] sm:$0xff] }
 0x1ec   :  { %v1551_v39 = vpack.c.bf16 %v866_v38, %v865_v37  ;;  %v1065_v37 = vld [vmem:[%s2243_s8] ss:$0 sm:$0xff] }
 0x1ed   :  { %v427_v42 = vadd.f32 %v1119_v41, %v2069_v9  ;;  %v1120_v43 = vpop.f32.mrb[14].mxu1  ;;  %1282 = vmatmul.mubr.f32.gmra.mrb[36].mxu0 %v480_v40  ;;  %v867_v40 = vld [vmem:[%s2241_s9 + $0x40] sm:$0xff]  ;;  %v868_v41 = vld [vmem:[%s2241_s9 + $0x48] sm:$0xff] }
 0x1ee   :  { %v1121_v44 = vpop.f32.mrb[15].mxu1 }
 0x1ef   :  { %v481_v6 = vmax.f32 %v427_v42, 0.0  ;;  %v1122_v7 = vadd.f32 %v1121_v44, %v1120_v43  ;;  %v1555_v42 = vpack.c.bf16 %v868_v41, %v867_v40  ;;  %v869_v43 = vld [vmem:[%s2241_s9 + $0x50] sm:$0xff]  ;;  %v870_v44 = vld [vmem:[%s2241_s9 + $0x58] sm:$0xff] }
 0x1f1   :  { %v432_v3 = vadd.f32 %v1122_v7, %v2069_v9  ;;  %v1123_v45 = vpop.f32.mrb[16].mxu1  ;;  %1284 = vmatprep.mubr.f32.mxu0 %v481_v6  ;;  %v1559_v6 = vpack.c.bf16 %v870_v44, %v869_v43  ;;  %v871_v7 = vld [vmem:[%s2241_s9 + $0x60] sm:$0xff] }
 0x1f2   :  { %v1124_v46 = vpop.f32.mrb[17].mxu1 }
 0x1f3   :  { %v482_v47 = vmax.f32 %v432_v3, 0.0  ;;  %v1125_v48 = vadd.f32 %v1124_v46, %v1123_v45  ;;  %v872_v3 = vld [vmem:[%s2241_s9 + $0x68] sm:$0xff]  ;;  %v2138_v46 = vld [vmem:[%s2242_s6] ss:$0 sm:$0xff] }
 0x1f4   :  { %v1563_v45 = vpack.c.bf16 %v872_v3, %v871_v7 }
 0x1f5   :  { %v437_v49 = vadd.f32 %v1125_v48, %v2069_v9  ;;  %v1126_v50 = vpop.f32.mrb[18].mxu1  ;;  %1285 = vmatmul.mubr.f32.gmra.mrb[38].mxu0 %v482_v47 }
 0x1f6   :  { %v1127_v51 = vpop.f32.mrb[19].mxu1 }
 0x1f7   :  { %v483_v52 = vmax.f32 %v437_v49, 0.0  ;;  %v1128_v53 = vadd.f32 %v1127_v51, %v1126_v50 }
 0x1f9   :  { %v442_v54 = vadd.f32 %v1128_v53, %v2069_v9  ;;  %v1129_v55 = vpop.f32.mrb[20].mxu1  ;;  %1287 = vmatprep.mubr.f32.mxu0 %v483_v52 }
 0x1fa   :  { %v1130_v56 = vpop.f32.mrb[21].mxu1 }
 0x1fb   :  { %v484_v57 = vmax.f32 %v442_v54, 0.0  ;;  %v1131_v58 = vadd.f32 %v1130_v56, %v1129_v55 }
 0x1fd   :  { %v447_v59 = vadd.f32 %v1131_v58, %v2069_v9  ;;  %v1132_v60 = vpop.f32.mrb[22].mxu1  ;;  %1288 = vmatmul.mubr.f32.gmra.mrb[40].mxu0 %v484_v57 }
 0x1fe   :  { %v1133_v61 = vpop.f32.mrb[23].mxu1 }
 0x1ff   :  { %v485_v62 = vmax.f32 %v447_v59, 0.0  ;;  %v1134_v63 = vadd.f32 %v1133_v61, %v1132_v60 }
 0x201   :  { %v452_v0 = vadd.f32 %v1134_v63, %v2069_v9  ;;  %v1135_v1 = vpop.f32.mrb[24].mxu1  ;;  %1290 = vmatprep.mubr.f32.mxu0 %v485_v62 }
 0x202   :  { %v1136_v2 = vpop.f32.mrb[25].mxu1 }
 0x203   :  { %v486_v4 = vmax.f32 %v452_v0, 0.0  ;;  %v1137_v5 = vadd.f32 %v1136_v2, %v1135_v1 }
 0x205   :  { %v457_v8 = vadd.f32 %v1137_v5, %v2069_v9  ;;  %v1138_v10 = vpop.f32.mrb[26].mxu1  ;;  %1291 = vmatmul.mubr.f32.gmra.mrb[42].mxu0 %v486_v4 }
 0x206   :  { %v1139_v11 = vpop.f32.mrb[27].mxu1 }
 0x207   :  { %v487_v12 = vmax.f32 %v457_v8, 0.0  ;;  %v1140_v13 = vadd.f32 %v1139_v11, %v1138_v10 }
 0x209   :  { %v462_v14 = vadd.f32 %v1140_v13, %v2069_v9  ;;  %v1141_v15 = vpop.f32.mrb[28].mxu1  ;;  %1293 = vmatprep.mubr.f32.mxu0 %v487_v12 }
 0x20a   :  { %v1142_v16 = vpop.f32.mrb[29].mxu1 }
 0x20b   :  { %v488_v17 = vmax.f32 %v462_v14, 0.0  ;;  %v1143_v18 = vadd.f32 %v1142_v16, %v1141_v15 }
 0x20d   :  { %v467_v19 = vadd.f32 %v1143_v18, %v2069_v9  ;;  %v1144_v20 = vpop.f32.mrb[30].mxu1  ;;  %1294 = vmatmul.mubr.f32.gmra.mrb[44].mxu0 %v488_v17 }
 0x20e   :  { %v1145_v21 = vpop.f32.mrb[31].mxu1 }
 0x20f   :  { %v489_v22 = vmax.f32 %v467_v19, 0.0  ;;  %v1146_v23 = vadd.f32 %v1145_v21, %v1144_v20 }
 0x211   :  { %v472_v24 = vadd.f32 %v1146_v23, %v2069_v9  ;;  %1296 = vmatprep.mubr.f32.mxu0 %v489_v22  ;;  %v860_v9 = vld [vmem:[%s2241_s9 + $0x8] sm:$0xff] }
 0x212   :  { %v1539_v31 = vpack.c.bf16 %v860_v9, %v859_v29 }
 0x213   :  { %v490_v25 = vmax.f32 %v472_v24, 0.0 }
 0x214   :  { %1540 = vmatprep.subr.bf16.mxu0 %v1539_v31  ;;  %1571 = vmatprep.subr.bf16.mxu1 %v1539_v31 }
 0x215   :  { %1297 = vmatmul.mubr.f32.gmra.mrb[46].mxu0 %v490_v25 }
 0x216   :  { %1542 = vmatpush3.bf16.msra.mxu0 %v1539_v31 }
 0x217   :  { %1544 = vmatprep.subr.bf16.mxu0 %v1543_v33 }
 0x21a   :  { %1546 = vmatpush3.bf16.msra.mxu0 %v1543_v33 }
 0x21b   :  { %1548 = vmatprep.subr.bf16.mxu0 %v1547_v36 }
 0x21e   :  { %1550 = vmatpush3.bf16.msra.mxu0 %v1547_v36 }
 0x21f   :  { %1552 = vmatprep.subr.bf16.mxu0 %v1551_v39 }
 0x222   :  { %1554 = vmatpush3.bf16.msra.mxu0 %v1551_v39 }
 0x223   :  { %1556 = vmatprep.subr.bf16.mxu0 %v1555_v42 }
 0x226   :  { %1558 = vmatpush3.bf16.msra.mxu0 %v1555_v42 }
 0x227   :  { %1560 = vmatprep.subr.bf16.mxu0 %v1559_v6 }
 0x22a   :  { %1562 = vmatpush3.bf16.msra.mxu0 %v1559_v6 }
 0x22b   :  { %1564 = vmatprep.subr.bf16.mxu0 %v1563_v45 }
 0x22e   :  { %1566 = vmatpush3.bf16.msra.mxu0 %v1563_v45 }
 0x2b0   :  { %v1277_v47 = vpop.f32.mrb[32].mxu0 }
 0x2b1   :  { %v586_v48 = vadd.f32 %v1277_v47, %v2138_v46  ;;  %v580_v49 = vpop.f32.mrb[33].mxu0 }
 0x2b2   :  { %v581_v50 = vadd.f32 %v2138_v46, %v580_v49 }
 0x2b3   :  { %v660_v52 = vmax.f32 %v586_v48, 0.0 }
 0x2b4   :  { %v659_v51 = vmax.f32 %v581_v50, 0.0 }
 0x2b6   :  { %1331 = vmatprep.mubr.f32.mxu1 %v659_v51 }
 0x2b7   :  { %1332 = vmatmul.mubr.f32.vlgmr.msra.gmra.mrb[32].mxu1 %v660_v52 }
 0x2b8   :  { %v1280_v53 = vpop.f32.mrb[34].mxu0  ;;  %1579 = vmatpush3.bf16.msra.mxu1 %v1539_v31 }
 0x2b9   :  { %v596_v54 = vadd.f32 %v1280_v53, %v2138_v46  ;;  %v590_v55 = vpop.f32.mrb[35].mxu0  ;;  %1572 = vmatprep.subr.bf16.mxu1 %v1543_v33 }
 0x2ba   :  { %v591_v56 = vadd.f32 %v2138_v46, %v590_v55 }
 0x2bb   :  { %v662_v58 = vmax.f32 %v596_v54, 0.0 }
 0x2bc   :  { %v661_v57 = vmax.f32 %v591_v56, 0.0  ;;  %1580 = vmatpush3.bf16.msra.mxu1 %v1543_v33 }
 0x2bd   :  { %1573 = vmatprep.subr.bf16.mxu1 %v1547_v36 }
 0x2be   :  { %1334 = vmatprep.mubr.f32.mxu1 %v661_v57 }
 0x2bf   :  { %1335 = vmatmul.mubr.f32.gmra.mrb[34].mxu1 %v662_v58 }
 0x2c0   :  { %v1283_v59 = vpop.f32.mrb[36].mxu0  ;;  %1581 = vmatpush3.bf16.msra.mxu1 %v1547_v36  ;;  %v1567_v36 = vpack.c.bf16 %v874_v35, %v873_v34 }
 0x2c1   :  { %v606_v60 = vadd.f32 %v1283_v59, %v2138_v46  ;;  %v600_v61 = vpop.f32.mrb[37].mxu0  ;;  %1574 = vmatprep.subr.bf16.mxu1 %v1551_v39 }
 0x2c2   :  { %v601_v62 = vadd.f32 %v2138_v46, %v600_v61  ;;  %1568 = vmatprep.subr.bf16.mxu0 %v1567_v36 }
 0x2c3   :  { %v664_v0 = vmax.f32 %v606_v60, 0.0  ;;  %1570 = vmatpush3.bf16.msra.mxu0 %v1567_v36 }
 0x2c4   :  { %v663_v63 = vmax.f32 %v601_v62, 0.0  ;;  %1582 = vmatpush3.bf16.msra.mxu1 %v1551_v39 }
 0x2c5   :  { %1575 = vmatprep.subr.bf16.mxu1 %v1555_v42 }
 0x2c6   :  { %1337 = vmatprep.mubr.f32.mxu1 %v663_v63 }
 0x2c7   :  { %1338 = vmatmul.mubr.f32.gmra.mrb[36].mxu1 %v664_v0 }
 0x2c8   :  { %v1286_v1 = vpop.f32.mrb[38].mxu0  ;;  %1583 = vmatpush3.bf16.msra.mxu1 %v1555_v42 }
 0x2c9   :  { %v616_v2 = vadd.f32 %v1286_v1, %v2138_v46  ;;  %v610_v4 = vpop.f32.mrb[39].mxu0  ;;  %1576 = vmatprep.subr.bf16.mxu1 %v1559_v6 }
 0x2ca   :  { %v611_v5 = vadd.f32 %v2138_v46, %v610_v4 }
 0x2cb   :  { %v666_v10 = vmax.f32 %v616_v2, 0.0 }
 0x2cc   :  { %v665_v8 = vmax.f32 %v611_v5, 0.0  ;;  %1584 = vmatpush3.bf16.msra.mxu1 %v1559_v6 }
 0x2cd   :  { %1577 = vmatprep.subr.bf16.mxu1 %v1563_v45 }
 0x2ce   :  { %1340 = vmatprep.mubr.f32.mxu1 %v665_v8 }
 0x2cf   :  { %1341 = vmatmul.mubr.f32.gmra.mrb[38].mxu1 %v666_v10 }
 0x2d0   :  { %v1289_v11 = vpop.f32.mrb[40].mxu0  ;;  %1585 = vmatpush3.bf16.msra.mxu1 %v1563_v45 }
 0x2d1   :  { %v626_v12 = vadd.f32 %v1289_v11, %v2138_v46  ;;  %v620_v13 = vpop.f32.mrb[41].mxu0  ;;  %1578 = vmatprep.subr.bf16.mxu1 %v1567_v36 }
 0x2d2   :  { %v621_v14 = vadd.f32 %v2138_v46, %v620_v13 }
 0x2d3   :  { %v668_v16 = vmax.f32 %v626_v12, 0.0 }
 0x2d4   :  { %v667_v15 = vmax.f32 %v621_v14, 0.0  ;;  %1586 = vmatpush3.bf16.msra.mxu1 %v1567_v36 }
 0x2d6   :  { %1343 = vmatprep.mubr.f32.mxu1 %v667_v15 }
 0x2d7   :  { %1344 = vmatmul.mubr.f32.gmra.mrb[40].mxu1 %v668_v16 }
 0x2d8   :  { %v1292_v17 = vpop.f32.mrb[42].mxu0 }
 0x2d9   :  { %v636_v18 = vadd.f32 %v1292_v17, %v2138_v46  ;;  %v630_v19 = vpop.f32.mrb[43].mxu0 }
 0x2da   :  { %v631_v20 = vadd.f32 %v2138_v46, %v630_v19 }
 0x2db   :  { %v670_v22 = vmax.f32 %v636_v18, 0.0 }
 0x2dc   :  { %v669_v21 = vmax.f32 %v631_v20, 0.0 }
 0x2de   :  { %1346 = vmatprep.mubr.f32.mxu1 %v669_v21 }
 0x2df   :  { %1347 = vmatmul.mubr.f32.gmra.mrb[42].mxu1 %v670_v22 }
 0x2e0   :  { %v1295_v23 = vpop.f32.mrb[44].mxu0 }
 0x2e1   :  { %v646_v24 = vadd.f32 %v1295_v23, %v2138_v46  ;;  %v640_v25 = vpop.f32.mrb[45].mxu0  ;;  %v2168_v23 = vld [vmem:[%s2244_s10] ss:$0 sm:$0xff] }
 0x2e2   :  { %v641_v26 = vadd.f32 %v2138_v46, %v640_v25 }
 0x2e3   :  { %v672_v28 = vmax.f32 %v646_v24, 0.0 }
 0x2e4   :  { %v671_v27 = vmax.f32 %v641_v26, 0.0 }
 0x2e6   :  { %1349 = vmatprep.mubr.f32.mxu1 %v671_v27 }
 0x2e7   :  { %1350 = vmatmul.mubr.f32.gmra.mrb[44].mxu1 %v672_v28 }
 0x2e8   :  { %v1298_v29 = vpop.f32.mrb[46].mxu0 }
 0x2e9   :  { %v656_v9 = vadd.f32 %v1298_v29, %v2138_v46  ;;  %v650_v30 = vpop.f32.mrb[47].mxu0 }
 0x2ea   :  { %v651_v31 = vadd.f32 %v2138_v46, %v650_v30 }
 0x2eb   :  { %v674_v33 = vmax.f32 %v656_v9, 0.0 }
 0x2ec   :  { %v673_v32 = vmax.f32 %v651_v31, 0.0 }
 0x2ee   :  { %1352 = vmatprep.mubr.f32.mxu1 %v673_v32 }
 0x2ef   :  { %1353 = vmatmul.mubr.f32.gmra.mrb[46].mxu1 %v674_v33 }
 0x38a   :  { %v1333_v38 = vpop.f32.mrb[32].mxu1 }
 0x38b   :  { %v770_v39 = vadd.f32 %v1333_v38, %v1065_v37  ;;  %v764_v40 = vpop.f32.mrb[33].mxu1 }
 0x38c   :  { %v765_v41 = vadd.f32 %v1065_v37, %v764_v40 }
 0x38d   :  { %v844_v43 = vmax.f32 %v770_v39, 0.0 }
 0x38e   :  { %v843_v42 = vmax.f32 %v765_v41, 0.0 }
 0x390   :  { %1387 = vmatprep.mubr.f32.mxu0 %v843_v42 }
 0x391   :  { %1388 = vmatmul.mubr.f32.vlgmr.msra.gmra.mrb[48].mxu0 %v844_v43 }
 0x392   :  { %v1336_v44 = vpop.f32.mrb[34].mxu1 }
 0x393   :  { %v780_v6 = vadd.f32 %v1336_v44, %v1065_v37  ;;  %v774_v7 = vpop.f32.mrb[35].mxu1 }
 0x394   :  { %v775_v3 = vadd.f32 %v1065_v37, %v774_v7 }
 0x395   :  { %v846_v46 = vmax.f32 %v780_v6, 0.0 }
 0x396   :  { %v845_v45 = vmax.f32 %v775_v3, 0.0 }
 0x398   :  { %1390 = vmatprep.mubr.f32.mxu0 %v845_v45 }
 0x399   :  { %1391 = vmatmul.mubr.f32.gmra.mrb[50].mxu0 %v846_v46 }
 0x39a   :  { %v1339_v47 = vpop.f32.mrb[36].mxu1 }
 0x39b   :  { %v790_v48 = vadd.f32 %v1339_v47, %v1065_v37  ;;  %v784_v49 = vpop.f32.mrb[37].mxu1 }
 0x39c   :  { %v785_v50 = vadd.f32 %v1065_v37, %v784_v49 }
 0x39d   :  { %v848_v52 = vmax.f32 %v790_v48, 0.0 }
 0x39e   :  { %v847_v51 = vmax.f32 %v785_v50, 0.0 }
 0x3a0   :  { %1393 = vmatprep.mubr.f32.mxu0 %v847_v51 }
 0x3a1   :  { %1394 = vmatmul.mubr.f32.gmra.mrb[52].mxu0 %v848_v52 }
 0x3a2   :  { %v1342_v53 = vpop.f32.mrb[38].mxu1 }
 0x3a3   :  { %v800_v54 = vadd.f32 %v1342_v53, %v1065_v37  ;;  %v794_v55 = vpop.f32.mrb[39].mxu1 }
 0x3a4   :  { %v795_v56 = vadd.f32 %v1065_v37, %v794_v55 }
 0x3a5   :  { %v850_v58 = vmax.f32 %v800_v54, 0.0 }
 0x3a6   :  { %v849_v57 = vmax.f32 %v795_v56, 0.0 }
 0x3a8   :  { %1396 = vmatprep.mubr.f32.mxu0 %v849_v57 }
 0x3a9   :  { %1397 = vmatmul.mubr.f32.gmra.mrb[54].mxu0 %v850_v58 }
 0x3aa   :  { %v1345_v59 = vpop.f32.mrb[40].mxu1 }
 0x3ab   :  { %v810_v60 = vadd.f32 %v1345_v59, %v1065_v37  ;;  %v804_v61 = vpop.f32.mrb[41].mxu1 }
 0x3ac   :  { %v805_v62 = vadd.f32 %v1065_v37, %v804_v61 }
 0x3ad   :  { %v852_v0 = vmax.f32 %v810_v60, 0.0 }
 0x3ae   :  { %v851_v63 = vmax.f32 %v805_v62, 0.0 }
 0x3b0   :  { %1399 = vmatprep.mubr.f32.mxu1 %v851_v63 }
 0x3b1   :  { %1400 = vmatmul.mubr.f32.vlgmr.msra.gmra.mrb[48].mxu1 %v852_v0 }
 0x3b2   :  { %v1348_v1 = vpop.f32.mrb[42].mxu1 }
 0x3b3   :  { %v820_v2 = vadd.f32 %v1348_v1, %v1065_v37  ;;  %v814_v4 = vpop.f32.mrb[43].mxu1 }
 0x3b4   :  { %v815_v5 = vadd.f32 %v1065_v37, %v814_v4 }
 0x3b5   :  { %v854_v10 = vmax.f32 %v820_v2, 0.0 }
 0x3b6   :  { %v853_v8 = vmax.f32 %v815_v5, 0.0 }
 0x3b8   :  { %1402 = vmatprep.mubr.f32.mxu1 %v853_v8 }
 0x3b9   :  { %1403 = vmatmul.mubr.f32.gmra.mrb[50].mxu1 %v854_v10 }
 0x3ba   :  { %v1351_v11 = vpop.f32.mrb[44].mxu1 }
 0x3bb   :  { %v830_v12 = vadd.f32 %v1351_v11, %v1065_v37  ;;  %v824_v13 = vpop.f32.mrb[45].mxu1 }
 0x3bc   :  { %v825_v14 = vadd.f32 %v1065_v37, %v824_v13 }
 0x3bd   :  { %v856_v16 = vmax.f32 %v830_v12, 0.0 }
 0x3be   :  { %v855_v15 = vmax.f32 %v825_v14, 0.0 }
 0x3c0   :  { %1405 = vmatprep.mubr.f32.mxu1 %v855_v15 }
 0x3c1   :  { %1406 = vmatmul.mubr.f32.gmra.mrb[52].mxu1 %v856_v16 }
 0x3c2   :  { %v1354_v17 = vpop.f32.mrb[46].mxu1 }
 0x3c3   :  { %v840_v18 = vadd.f32 %v1354_v17, %v1065_v37  ;;  %v834_v19 = vpop.f32.mrb[47].mxu1 }
 0x3c4   :  { %v835_v20 = vadd.f32 %v1065_v37, %v834_v19 }
 0x3c5   :  { %v858_v22 = vmax.f32 %v840_v18, 0.0 }
 0x3c6   :  { %v857_v21 = vmax.f32 %v835_v20, 0.0 }
 0x3c8   :  { %1408 = vmatprep.mubr.f32.mxu1 %v857_v21 }
 0x3c9   :  { %1409 = vmatmul.mubr.f32.gmra.mrb[54].mxu1 %v858_v22 }
 0x464   :  { %v1389_v24 = vpop.f32.mrb[48].mxu0 }
 0x465   :  { %v954_v25 = vadd.f32 %v1389_v24, %v2168_v23  ;;  %v948_v26 = vpop.f32.mrb[49].mxu0 }
 0x466   :  { %v949_v27 = vadd.f32 %v2168_v23, %v948_v26 }
 0x467   :  { %1588 = vtanh.f32 %v954_v25 }
 0x468   :  { %1590 = vtanh.f32 %v949_v27 }
 0x46c   :  { %v1392_v28 = vpop.f32.mrb[50].mxu0 }
 0x46d   :  { %v964_v29 = vadd.f32 %v1392_v28, %v2168_v23  ;;  %v958_v9 = vpop.f32.mrb[51].mxu0 }
 0x46e   :  { %v959_v30 = vadd.f32 %v2168_v23, %v958_v9 }
 0x46f   :  { %1592 = vtanh.f32 %v964_v29 }
 0x470   :  { %1594 = vtanh.f32 %v959_v30 }
 0x471   :  { %v1589_v31 = vpop.eup %1588 }
 0x472   :  { %v1591_v32 = vpop.eup %1590  ;;  %1044 = vst [vmem:[%s2245_s11 + $0x8] sm:$0xff] %v1589_v31 }
 0x473   :  { %1043 = vst [vmem:[%s2245_s11] sm:$0xff] %v1591_v32 }
 0x474   :  { %v1395_v33 = vpop.f32.mrb[52].mxu0 }
 0x475   :  { %v974_v34 = vadd.f32 %v1395_v33, %v2168_v23  ;;  %v968_v35 = vpop.f32.mrb[53].mxu0 }
 0x476   :  { %v969_v36 = vadd.f32 %v2168_v23, %v968_v35 }
 0x477   :  { %1596 = vtanh.f32 %v974_v34 }
 0x478   :  { %1598 = vtanh.f32 %v969_v36 }
 0x479   :  { %v1593_v37 = vpop.eup %1592 }
 0x47a   :  { %v1595_v38 = vpop.eup %1594  ;;  %1046 = vst [vmem:[%s2245_s11 + $0x18] sm:$0xff] %v1593_v37 }
 0x47b   :  { %1045 = vst [vmem:[%s2245_s11 + $0x10] sm:$0xff] %v1595_v38 }
 0x47c   :  { %v1398_v39 = vpop.f32.mrb[54].mxu0 }
 0x47d   :  { %v984_v40 = vadd.f32 %v1398_v39, %v2168_v23  ;;  %v978_v41 = vpop.f32.mrb[55].mxu0 }
 0x47e   :  { %v979_v42 = vadd.f32 %v2168_v23, %v978_v41 }
 0x47f   :  { %1600 = vtanh.f32 %v984_v40 }
 0x480   :  { %1602 = vtanh.f32 %v979_v42 }
 0x481   :  { %v1597_v43 = vpop.eup %1596 }
 0x482   :  { %v1599_v44 = vpop.eup %1598  ;;  %1048 = vst [vmem:[%s2245_s11 + $0x28] sm:$0xff] %v1597_v43 }
 0x483   :  { %1047 = vst [vmem:[%s2245_s11 + $0x20] sm:$0xff] %v1599_v44 }
 0x484   :  { %v1401_v6 = vpop.f32.mrb[48].mxu1 }
 0x485   :  { %v994_v7 = vadd.f32 %v1401_v6, %v2168_v23  ;;  %v988_v3 = vpop.f32.mrb[49].mxu1 }
 0x486   :  { %v989_v45 = vadd.f32 %v2168_v23, %v988_v3 }
 0x487   :  { %1604 = vtanh.f32 %v994_v7 }
 0x488   :  { %1606 = vtanh.f32 %v989_v45 }
 0x489   :  { %v1601_v46 = vpop.eup %1600 }
 0x48a   :  { %v1603_v47 = vpop.eup %1602  ;;  %1050 = vst [vmem:[%s2245_s11 + $0x38] sm:$0xff] %v1601_v46 }
 0x48b   :  { %1049 = vst [vmem:[%s2245_s11 + $0x30] sm:$0xff] %v1603_v47 }
 0x48c   :  { %v1404_v48 = vpop.f32.mrb[50].mxu1 }
 0x48d   :  { %v1004_v49 = vadd.f32 %v1404_v48, %v2168_v23  ;;  %v998_v50 = vpop.f32.mrb[51].mxu1 }
 0x48e   :  { %v999_v51 = vadd.f32 %v2168_v23, %v998_v50 }
 0x48f   :  { %1608 = vtanh.f32 %v1004_v49 }
 0x490   :  { %1610 = vtanh.f32 %v999_v51 }
 0x491   :  { %v1605_v52 = vpop.eup %1604 }
 0x492   :  { %v1607_v53 = vpop.eup %1606  ;;  %1052 = vst [vmem:[%s2245_s11 + $0x48] sm:$0xff] %v1605_v52 }
 0x493   :  { %1051 = vst [vmem:[%s2245_s11 + $0x40] sm:$0xff] %v1607_v53 }
 0x494   :  { %v1407_v54 = vpop.f32.mrb[52].mxu1 }
 0x495   :  { %v1014_v55 = vadd.f32 %v1407_v54, %v2168_v23  ;;  %v1008_v56 = vpop.f32.mrb[53].mxu1 }
 0x496   :  { %v1009_v57 = vadd.f32 %v2168_v23, %v1008_v56 }
 0x497   :  { %1612 = vtanh.f32 %v1014_v55 }
 0x498   :  { %1614 = vtanh.f32 %v1009_v57 }
 0x499   :  { %v1609_v58 = vpop.eup %1608 }
 0x49a   :  { %v1611_v59 = vpop.eup %1610  ;;  %1054 = vst [vmem:[%s2245_s11 + $0x58] sm:$0xff] %v1609_v58 }
 0x49b   :  { %1053 = vst [vmem:[%s2245_s11 + $0x50] sm:$0xff] %v1611_v59 }
 0x49c   :  { %v1410_v60 = vpop.f32.mrb[54].mxu1 }
 0x49d   :  { %v1024_v61 = vadd.f32 %v1410_v60, %v2168_v23  ;;  %v1018_v62 = vpop.f32.mrb[55].mxu1 }
 0x49e   :  { %v1019_v63 = vadd.f32 %v2168_v23, %v1018_v62 }
 0x49f   :  { %1616 = vtanh.f32 %v1024_v61 }
 0x4a0   :  { %1618 = vtanh.f32 %v1019_v63 }
 0x4a1   :  { %v1613_v0 = vpop.eup %1612 }
 0x4a2   :  { %v1615_v1 = vpop.eup %1614  ;;  %1056 = vst [vmem:[%s2245_s11 + $0x68] sm:$0xff] %v1613_v0 }
 0x4a3   :  { %1055 = vst [vmem:[%s2245_s11 + $0x60] sm:$0xff] %v1615_v1 }
 0x4a9   :  { %v1617_v2 = vpop.eup %1616 }
 0x4aa   :  { %v1619_v4 = vpop.eup %1618  ;;  %1058 = vst [vmem:[%s2245_s11 + $0x78] sm:$0xff] %v1617_v2 }
 0x4ab   :  { %1057 = vst [vmem:[%s2245_s11 + $0x70] sm:$0xff] %v1619_v4 }

</bundles_post_ra>
